<compile_context>
chip_gen: v7x
topology: tpu7x:2x2x1
jax: 0.10.0
libtpu: 0.0.40
codegen_flags: <defaults>
</compile_context>

<pallas_src>
import functools

import jax
import jax.numpy as jnp
from jax.experimental import pallas as pl
from jax.experimental.pallas import tpu as pltpu


def _round_up(n, m):
    return ((n + m - 1) // m) * m


def _focal_terms(x, t, alpha, gamma, binary_targets):
    """Elementwise focal loss (reduction='none'), numerically stable, f32."""
    e = jnp.exp(-jnp.abs(x))                                  # EUP exp
    bce = jnp.maximum(x, 0.0) - x * t + jnp.log(1.0 + e)      # EUP log
    if binary_targets:
        # pt is the model probability of the true class; exact for t in {0,1}.
        # Saves one exp per element (EUP is the binding unit on v6e/v7x).
        p = jnp.where(x >= 0.0, 1.0, e) / (1.0 + e)           # == sigmoid(x)
        pt = t * p + (1.0 - t) * (1.0 - p)
    else:
        pt = jnp.exp(-bce)                                    # exact for soft labels
    one_m_pt = 1.0 - pt
    if gamma == 1.0:                                          # module default: skip pow
        w = one_m_pt
    elif gamma == 2.0:
        w = one_m_pt * one_m_pt
    else:
        w = jnp.power(jnp.maximum(one_m_pt, 0.0), gamma)      # guard pt>1 rounding
    return alpha * w * bce


def _sublane_partial_sums(x):
    """(tb, w) f32 -> (8, w): tree-sum groups of 8 sublanes (full-tile stores)."""
    tb, _ = x.shape
    parts = [x[r:r + 8, :] for r in range(0, tb, 8)]
    while len(parts) > 1:
        nxt = [parts[j] + parts[j + 1] for j in range(0, len(parts) - 1, 2)]
        if len(parts) % 2:
            nxt.append(parts[-1])
        parts = nxt
    return parts[0]


def _focal_sum_kernel(x_ref, t_ref, o_ref, *, alpha, gamma, binary_targets,
                      full_rows, rem, tb, p_rows):
    """Per-tile partial sums of the focal loss over a lane-dense slab."""
    i = pl.program_id(0)
    nt = pl.num_programs(0)

    x = x_ref[...].astype(jnp.float32)
    t = t_ref[...].astype(jnp.float32)
    focal = _focal_terms(x, t, alpha, gamma, binary_targets)

    def _partial(v):
        if p_rows == 8:
            return _sublane_partial_sums(v)
        return jnp.sum(v, axis=0, keepdims=True)

    @pl.when(i < nt - 1)                  # full tiles: mask-free fast path
    def _():
        o_ref[...] = _partial(focal)

    @pl.when(i == nt - 1)                 # tail tile: mask padding / stale rows
    def _():
        shape = focal.shape
        grow = jax.lax.broadcasted_iota(jnp.int32, shape, 0) + i * tb
        valid = grow < full_rows
        if rem:
            col = jax.lax.broadcasted_iota(jnp.int32, shape, 1)
            valid = valid | ((grow == full_rows) & (col < rem))
        o_ref[...] = _partial(jnp.where(valid, focal, 0.0))


def _focal_map_kernel(x_ref, t_ref, o_ref, *, alpha, gamma, binary_targets):
    """Elementwise focal loss (reduction='none'); tail sliced off in wrapper."""
    x = x_ref[...].astype(jnp.float32)
    t = t_ref[...].astype(jnp.float32)
    o_ref[...] = _focal_terms(x, t, alpha, gamma, binary_targets).astype(o_ref.dtype)


@functools.partial(
    jax.jit,
    static_argnames=("alpha", "gamma", "reduction", "binary_targets",
                     "lane_width", "block_rows", "xla_fallback_elements"))
def focal_loss(inputs, targets, alpha=0.25, gamma=1.0, reduction="mean", *,
               binary_targets=False, lane_width=512, block_rows=512,
               xla_fallback_elements=0):
    """FocalLoss.forward(inputs, targets); inputs/targets of any (same) shape."""
    if reduction not in ("mean", "sum", "none"):
        raise ValueError(f"unsupported reduction: {reduction}")

    alpha = float(alpha)
    gamma = float(gamma)
    orig_shape = inputs.shape
    n = inputs.size

    # Tiny problems (e.g. PETA's 16x35) are pure launch overhead in Pallas;
    # let XLA fuse them if the caller opts in via xla_fallback_elements.
    if n <= xla_fallback_elements:
        focal = _focal_terms(inputs.astype(jnp.float32),
                             targets.astype(jnp.float32),
                             alpha, gamma, binary_targets)
        if reduction == "mean":
            return focal.mean()
        if reduction == "sum":
            return focal.sum()
        return focal.astype(inputs.dtype)

    w = max(128, _round_up(lane_width, 128))          # lane-dense width
    block_rows = max(8, _round_up(block_rows, 8))     # sublane-aligned tile rows

    # Flatten to a lane-dense (rows, w) view.  The reshape is free; only the
    # flat tail is padded, and only when w does not divide n (one small copy,
    # never the 3.66x class-dim lane padding of the previous version).
    n_pad = _round_up(n, w)
    x = inputs.reshape(-1)
    t = targets.reshape(-1)
    if n_pad != n:
        x = jnp.pad(x, (0, n_pad - n))
        t = jnp.pad(t, (0, n_pad - n))
    rows = n_pad // w
    x = x.reshape(rows, w)
    t = t.reshape(rows, w)

    tb = block_rows if rows >= block_rows else rows   # full-dim block when small
    n_tiles = pl.cdiv(rows, tb)
    full_rows, rem = divmod(n, w)

    in_specs = [pl.BlockSpec((tb, w), lambda i: (i, 0)),
                pl.BlockSpec((tb, w), lambda i: (i, 0))]
    bytes_in = n_pad * (x.dtype.itemsize + t.dtype.itemsize)
    n_transc = (2 if binary_targets else 3) * n_pad

    if reduction in ("mean", "sum"):
        p_rows = 8 if tb % 8 == 0 else 1              # tb % 8 != 0 only when n_tiles == 1
        kernel = functools.partial(
            _focal_sum_kernel, alpha=alpha, gamma=gamma,
            binary_targets=binary_targets, full_rows=full_rows, rem=rem,
            tb=tb, p_rows=p_rows)
        partials = pl.pallas_call(
            kernel,
            out_shape=jax.ShapeDtypeStruct((n_tiles * p_rows, w), jnp.float32),
            grid=(n_tiles,),
            in_specs=in_specs,
            out_specs=pl.BlockSpec((p_rows, w), lambda i: (i, 0)),
            compiler_params=pltpu.CompilerParams(
                dimension_semantics=("parallel",)),   # independent tiles -> both TCs on v7x
            cost_estimate=pl.CostEstimate(
                flops=12 * n_pad,
                transcendentals=n_transc,
                bytes_accessed=bytes_in + n_tiles * p_rows * w * 4),
        )(x, t)
        total = jnp.sum(partials)
        return total / n if reduction == "mean" else total

    # reduction == 'none'
    kernel = functools.partial(_focal_map_kernel, alpha=alpha, gamma=gamma,
                               binary_targets=binary_targets)
    out = pl.pallas_call(
        kernel,
        out_shape=jax.ShapeDtypeStruct((rows, w), inputs.dtype),
        grid=(n_tiles,),
        in_specs=in_specs,
        out_specs=pl.BlockSpec((tb, w), lambda i: (i, 0)),
        compiler_params=pltpu.CompilerParams(
            dimension_semantics=("parallel",)),
        cost_estimate=pl.CostEstimate(
            flops=12 * n_pad,
            transcendentals=n_transc,
            bytes_accessed=bytes_in + n_pad * inputs.dtype.itemsize),
    )(x, t)
    out = out.reshape(-1)
    if n_pad != n:
        out = out[:n]
    return out.reshape(orig_shape)


def reference_focal_loss(inputs, targets, alpha=0.25, gamma=1.0,
                         reduction="mean"):
    """Pure-JAX reference mirroring the PyTorch FocalLoss forward."""
    x = inputs.astype(jnp.float32)
    t = targets.astype(jnp.float32)
    bce = jnp.maximum(x, 0.0) - x * t + jnp.log(1.0 + jnp.exp(-jnp.abs(x)))
    pt = jnp.exp(-bce)
    focal = alpha * (1.0 - pt) ** gamma * bce
    if reduction == "mean":
        return focal.mean()
    if reduction == "sum":
        return focal.sum()
    return focal


if __name__ == "__main__":
    key = jax.random.PRNGKey(0)
    kx, kt, ks = jax.random.split(key, 3)

    # PETA: multi-label logits over 35 pedestrian attributes.
    B, C = 16, 35
    logits = 2.0 * jax.random.normal(kx, (B, C), jnp.float32)
    targets = jax.random.bernoulli(kt, 0.3, (B, C)).astype(jnp.float32)

    # default reduction='mean' (exact general pt = exp(-bce) path)
    loss = jax.block_until_ready(focal_loss(logits, targets))
    ref = reference_focal_loss(logits, targets)
    assert loss.shape == (), loss.shape
    assert jnp.allclose(loss, ref, atol=1e-5, rtol=1e-5), (loss, ref)

    # reduction='sum' with the EUP-reduced binary-target path (exact for 0/1 labels)
    loss_sum = jax.block_until_ready(
        focal_loss(logits, targets, reduction="sum", binary_targets=True))
    ref_sum = reference_focal_loss(logits, targets, reduction="sum")
    assert jnp.allclose(loss_sum, ref_sum, atol=1e-4, rtol=1e-5), (loss_sum, ref_sum)

    # reduction='none'
    loss_map = jax.block_until_ready(focal_loss(logits, targets, reduction="none"))
    ref_map = reference_focal_loss(logits, targets, reduction="none")
    assert loss_map.shape == (B, C), loss_map.shape
    assert jnp.allclose(loss_map, ref_map, atol=1e-5, rtol=1e-5)

    # Multi-tile grid + tail-mask path: small blocks force several grid steps,
    # soft labels exercise the general pt = exp(-bce) path.
    B2, C2 = 64, 35
    kx2, kt2 = jax.random.split(ks)
    logits2 = 3.0 * jax.random.normal(kx2, (B2, C2), jnp.float32)
    soft_t2 = jax.random.uniform(kt2, (B2, C2), jnp.float32)
    loss2 = jax.block_until_ready(
        focal_loss(logits2, soft_t2, reduction="mean",
                   lane_width=128, block_rows=8))
    ref2 = reference_focal_loss(logits2, soft_t2)
    assert jnp.allclose(loss2, ref2, atol=1e-5, rtol=1e-5), (loss2, ref2)

    print("KERNEL_OK")
</pallas_src>

<mosaic_0001>
module attributes {stable_mosaic.version = 11 : i64} {
  func.func @_focal_sum_kernel(%arg0: i32, %arg1: memref<2x512xf32, #tpu.memory_space<vmem>>, %arg2: memref<2x512xf32, #tpu.memory_space<vmem>>, %arg3: memref<1x512xf32, #tpu.memory_space<vmem>>) attributes {dimension_semantics = [#tpu.dimension_semantics<parallel>], iteration_bounds = array<i64: 1>, scalar_prefetch = 0 : i64, scratch_operands = 0 : i64, tpu.core_type = #tpu.core_type<tc>, window_params = [{transform_indices = @transform_0, window_bounds = array<i64: 2, 512>}, {transform_indices = @transform_1, window_bounds = array<i64: 2, 512>}, {transform_indices = @transform_2, window_bounds = array<i64: 1, 512>}]} {
    %c0 = arith.constant 0 : index
    %c0_0 = arith.constant 0 : index
    %0 = vector.load %arg1[%c0, %c0_0] : memref<2x512xf32, #tpu.memory_space<vmem>>, vector<2x512xf32>
    %c0_1 = arith.constant 0 : index
    %c0_2 = arith.constant 0 : index
    %1 = vector.load %arg2[%c0_1, %c0_2] : memref<2x512xf32, #tpu.memory_space<vmem>>, vector<2x512xf32>
    %2 = math.absf %0 : vector<2x512xf32>
    %cst = arith.constant 0.000000e+00 : f32
    %3 = vector.broadcast %cst : f32 to vector<2x512xf32>
    %4 = arith.subf %3, %2 : vector<2x512xf32>
    %5 = math.exp %4 : vector<2x512xf32>
    %cst_3 = arith.constant 0.000000e+00 : f32
    %6 = vector.broadcast %cst_3 : f32 to vector<2x512xf32>
    %7 = arith.maximumf %0, %6 : vector<2x512xf32>
    %8 = arith.mulf %0, %1 : vector<2x512xf32>
    %9 = arith.subf %7, %8 : vector<2x512xf32>
    %cst_4 = arith.constant 1.000000e+00 : f32
    %10 = vector.broadcast %cst_4 : f32 to vector<2x512xf32>
    %11 = arith.addf %10, %5 : vector<2x512xf32>
    %12 = math.log %11 : vector<2x512xf32>
    %13 = arith.addf %9, %12 : vector<2x512xf32>
    %cst_5 = arith.constant 0.000000e+00 : f32
    %14 = vector.broadcast %cst_5 : f32 to vector<2x512xf32>
    %15 = arith.subf %14, %13 : vector<2x512xf32>
    %16 = math.exp %15 : vector<2x512xf32>
    %cst_6 = arith.constant 1.000000e+00 : f32
    %17 = vector.broadcast %cst_6 : f32 to vector<2x512xf32>
    %18 = arith.subf %17, %16 : vector<2x512xf32>
    %cst_7 = arith.constant 2.500000e-01 : f32
    %19 = vector.broadcast %cst_7 : f32 to vector<2x512xf32>
    %20 = arith.mulf %19, %18 : vector<2x512xf32>
    %21 = arith.mulf %20, %13 : vector<2x512xf32>
    %c0_i32 = arith.constant 0 : i32
    %22 = arith.cmpi slt, %arg0, %c0_i32 : i32
    %23 = arith.extui %22 : i1 to i32
    %c0_i32_8 = arith.constant 0 : i32
    %24 = arith.cmpi ne, %23, %c0_i32_8 : i32
    scf.if %24 {
      %cst_11 = arith.constant dense<0.000000e+00> : vector<512xf32>
      %28 = vector.multi_reduction <add>, %21, %cst_11 [0] : vector<2x512xf32> to vector<512xf32>
      %29 = vector.shape_cast %28 : vector<512xf32> to vector<1x512xf32>
      %c0_12 = arith.constant 0 : index
      %c0_13 = arith.constant 0 : index
      %30 = vector.load %arg3[%c0_12, %c0_13] : memref<1x512xf32, #tpu.memory_space<vmem>>, vector<1x512xf32>
      tpu.vector_store %arg3[%c0_12, %c0_13], %29 {strides = array<i32>} : memref<1x512xf32, #tpu.memory_space<vmem>>, vector<1x512xf32>,
    } else {
    }
    %c0_i32_9 = arith.constant 0 : i32
    %25 = arith.cmpi eq, %arg0, %c0_i32_9 : i32
    %26 = arith.extui %25 : i1 to i32
    %c0_i32_10 = arith.constant 0 : i32
    %27 = arith.cmpi ne, %26, %c0_i32_10 : i32
    scf.if %27 {
      %28 = tpu.iota {dimensions = array<i32: 0>} : vector<2x512xi32>
      %c2_i32 = arith.constant 2 : i32
      %29 = arith.muli %arg0, %c2_i32 : i32
      %30 = vector.broadcast %29 : i32 to vector<2x512xi32>
      %31 = arith.addi %28, %30 : vector<2x512xi32>
      %c1_i32 = arith.constant 1 : i32
      %32 = vector.broadcast %c1_i32 : i32 to vector<2x512xi32>
      %33 = arith.cmpi slt, %31, %32 : vector<2x512xi32>
      %34 = tpu.iota {dimensions = array<i32: 1>} : vector<2x512xi32>
      %c1_i32_11 = arith.constant 1 : i32
      %35 = vector.broadcast %c1_i32_11 : i32 to vector<2x512xi32>
      %36 = arith.cmpi eq, %31, %35 : vector<2x512xi32>
      %c48_i32 = arith.constant 48 : i32
      %37 = vector.broadcast %c48_i32 : i32 to vector<2x512xi32>
      %38 = arith.cmpi slt, %34, %37 : vector<2x512xi32>
      %39 = arith.andi %36, %38 : vector<2x512xi1>
      %40 = arith.ori %33, %39 : vector<2x512xi1>
      %cst_12 = arith.constant 0.000000e+00 : f32
      %41 = vector.broadcast %cst_12 : f32 to vector<2x512xf32>
      %42 = arith.select %40, %21, %41 : vector<2x512xi1>, vector<2x512xf32>
      %cst_13 = arith.constant dense<0.000000e+00> : vector<512xf32>
      %43 = vector.multi_reduction <add>, %42, %cst_13 [0] : vector<2x512xf32> to vector<512xf32>
      %44 = vector.shape_cast %43 : vector<512xf32> to vector<1x512xf32>
      %c0_14 = arith.constant 0 : index
      %c0_15 = arith.constant 0 : index
      %45 = vector.load %arg3[%c0_14, %c0_15] : memref<1x512xf32, #tpu.memory_space<vmem>>, vector<1x512xf32>
      tpu.vector_store %arg3[%c0_14, %c0_15], %44 {strides = array<i32>} : memref<1x512xf32, #tpu.memory_space<vmem>>, vector<1x512xf32>,
    } else {
    }
    return
  }
  func.func @transform_0(%arg0: i32) -> (i32, i32) {
    %c0_i32 = arith.constant 0 : i32
    %c0_i32_0 = arith.constant 0 : i32
    return %arg0, %c0_i32 : i32, i32
  }
  func.func @transform_1(%arg0: i32) -> (i32, i32) {
    %c0_i32 = arith.constant 0 : i32
    %c0_i32_0 = arith.constant 0 : i32
    return %arg0, %c0_i32 : i32, i32
  }
  func.func @transform_2(%arg0: i32) -> (i32, i32) {
    %c0_i32 = arith.constant 0 : i32
    %c0_i32_0 = arith.constant 0 : i32
    return %arg0, %c0_i32 : i32, i32
  }
}

</mosaic_0001>

<bundles_post_ra>
// kernel: focal_loss.1
= control target key start
LH: loop header
LB: loop body
LE: loop exit
PB: predicated region body
PF: predicated region fallthrough
CT: control target
= control target key end

     0   :  { %v123_v15 = vlaneseq  ;;  %v248_v16 = vmov 1983009808   ;;  %vm173_vm5 = vcmask 1041408   ;;  %v249_v43 = vmov 1966171168   ;;  %s281_s0 = inlined_call_operand.vmem [shape: f32[2,512], index: 0, kind: input, shape index: {}]   ;;  %s282_s1 = inlined_call_operand.vmem [shape: f32[2,512], index: 1, kind: input, shape index: {}]   ;;  %s283_s2 = inlined_call_operand.vmem [shape: f32[1,512], index: 2, kind: output, shape index: {}]  }
   0x1   :  { %v11_v0 = vld [vmem:[%s281_s0] sm:$0xff]  ;;  %v150_v17 = vunpack.c.l.s4 %v248_v16  ;;  %v209_v44 = vunpack.c.l.s4 %v249_v43 }
   0x2   :  { %v13_v1 = vand.u32 2147483647, %v11_v0  ;;  %v12_v6 = vld [vmem:[%s282_s1] sm:$0xff]  ;;  %v17_v7 = vmax.f32 %v11_v0, 0.0  ;;  %v130_v18 = vand.u32 127, %v123_v15  ;;  %v124_v19 = vshrl.u32 %v123_v15, 7 }
   0x3   :  { %v18_v8 = vmul.f32 %v12_v6, %v11_v0  ;;  %v151_v20 = vunpack.c.0.s8 %v150_v17  ;;  %v210_v53 = vunpack.c.0.s8 %v209_v44  ;;  %vm233_vm6 = vcmp.lt.s32.totalorder %v123_v15, 512 }
   0x4   :  { %v14_v2 = vsub.f32 0.0, %v13_v1  ;;  %vm134_vm0 = vcmp.eq.s32.totalorder %v124_v19, 1  ;;  %vm135_vm1 = vcmp.lt.s32.totalorder %v130_v18, 48  ;;  %vm128_vm2 = vcmp.lt.s32.totalorder %v124_v19, 1 }
   0x5   :  { %v19_v9 = vsub.f32 %v17_v7, %v18_v8  ;;  %vm139_vm3 = vmand %vm134_vm0, %vm135_vm1  ;;  %v154_v24 = vsub.s32 %v151_v20, %v124_v19  ;;  %v213_v1 = vsub.s32 %v210_v53, %v124_v19 }
   0x6   :  { %v15_v3 = vmul.f32 1.442695, %v14_v2  ;;  %vm143_vm4 = vmor %vm128_vm2, %vm139_vm3 }
   0x8   :  { %242 = vpow2.f32 %v15_v3 }
  0x12   :  { %v243_v4 = vpop.eup %242 }
  0x13   :  { %v20_v5 = vadd.f32 1.0, %v243_v4 }
  0x15   :  { %244 = vlog2.f32 %v20_v5 }
  0x1f   :  { %v245_v10 = vpop.eup %244 }
  0x20   :  { %v22_v11 = vmul.f32 0.6931472, %v245_v10 }
  0x22   :  { %v23_v12 = vadd.f32 %v22_v11, %v19_v9 }
  0x24   :  { %v24_v13 = vsub.f32 0.0, %v23_v12 }
  0x26   :  { %v25_v14 = vmul.f32 1.442695, %v24_v13 }
  0x28   :  { %246 = vpow2.f32 %v25_v14 }
  0x32   :  { %v247_v21 = vpop.eup %246 }
  0x33   :  { %v27_v22 = vsub.f32 1.0, %v247_v21 }
  0x35   :  { %v28_v23 = vmul.f32 0.25, %v27_v22 }
  0x37   :  { %v29_v25 = vmul.f32 %v28_v23, %v23_v12 }
  0x39   :  { %v148_v26 = vcombine.high %v29_v25, %v29_v25  ;;  %v155_v27 = vrot.slane %v29_v25, %v154_v24 }
  0x3b   :  { %v162_v28 = vrot.slane %v148_v26, %v154_v24  ;;  %v163_v29 = vcombine.high %v155_v27, %v155_v27  ;;  %v169_v30 = vsel %vm143_vm4, %v155_v27, 0.0 }
  0x3c   :  { %v174_v31 = vsel %vm173_vm5, %v169_v30, 0.0 }
  0x3d   :  { %v164_v32 = vcombine.high %v162_v28, %v162_v28  ;;  %v170_v33 = vsel %vm128_vm2, %v163_v29, 0.0  ;;  %v171_v34 = vsel %vm128_vm2, %v162_v28, 0.0  ;;  %v175_v35 = vrot.slane %v174_v31, 4 }
  0x3e   :  { %v181_v36 = vsel %vm173_vm5, %v170_v33, 0.0  ;;  %v188_v37 = vsel %vm173_vm5, %v171_v34, 0.0 }
  0x3f   :  { %v172_v38 = vsel %vm128_vm2, %v164_v32, 0.0  ;;  %v176_v39 = vadd.f32 %v175_v35, %v174_v31  ;;  %v182_v40 = vrot.slane %v181_v36, 4  ;;  %v189_v41 = vrot.slane %v188_v37, 4 }
  0x40   :  { %v195_v42 = vsel %vm173_vm5, %v172_v38, 0.0 }
  0x41   :  { %v177_v45 = vrot.slane %v176_v39, 2  ;;  %v183_v46 = vadd.f32 %v182_v40, %v181_v36  ;;  %v190_v47 = vadd.f32 %v189_v41, %v188_v37  ;;  %v196_v48 = vrot.slane %v195_v42, 4 }
  0x43   :  { %v178_v49 = vadd.f32 %v177_v45, %v176_v39  ;;  %v184_v50 = vrot.slane %v183_v46, 2  ;;  %v191_v51 = vrot.slane %v190_v47, 2  ;;  %v197_v52 = vadd.f32 %v196_v48, %v195_v42 }
  0x45   :  { %v179_v54 = vrot.slane %v178_v49, 1  ;;  %v185_v55 = vadd.f32 %v184_v50, %v183_v46  ;;  %v192_v56 = vadd.f32 %v191_v51, %v190_v47  ;;  %v198_v57 = vrot.slane %v197_v52, 2 }
  0x47   :  { %v180_v58 = vadd.f32 %v179_v54, %v178_v49  ;;  %v186_v59 = vrot.slane %v185_v55, 1  ;;  %v193_v60 = vrot.slane %v192_v56, 1  ;;  %v199_v61 = vadd.f32 %v198_v57, %v197_v52 }
  0x49   :  { %v187_v62 = vadd.f32 %v186_v59, %v185_v55  ;;  %v194_v63 = vadd.f32 %v193_v60, %v192_v56  ;;  %v200_v0 = vrot.slane %v199_v61, 1 }
  0x4b   :  { %v201_v2 = vadd.f32 %v200_v0, %v199_v61  ;;  %v206_v3 = vcombine.low %v180_v58, %v187_v62 }
  0x4d   :  { %v207_v4 = vcombine.low %v194_v63, %v201_v2  ;;  %v214_v5 = vrot.slane %v206_v3, %v213_v1 }
  0x4f   :  { %v221_v6 = vrot.slane %v207_v4, %v213_v1 }
  0x51   :  { %v222_v7 = vcombine.low %v214_v5, %v221_v6 }
  0x53   :  { %v229_v8 = vrot.slane %v222_v7, %v213_v1 }
  0x55   :  { %235 = vst.msk [vmem:[%s283_s2] sm:$0xf] %vm233_vm6, %v229_v8 }

</bundles_post_ra>
